<compile_context>
chip_gen: v7x
topology: tpu7x:2x2x1
jax: 0.10.0
libtpu: 0.0.40
codegen_flags: <defaults>
</compile_context>

<pallas_src>
import functools

import jax
import jax.numpy as jnp
from jax.experimental import pallas as pl
from jax.experimental.pallas import tpu as pltpu


def bilstm_kernel(x_pair_ref,   # (T*B, 2C)  row-block s = [x_s | x_{T-1-s}]
                  w_pair_ref,   # (2C, 8H)   block-structured input projection
                  b_all_ref,    # (1, 8H)    folded b_ih + b_hh, both directions
                  whh_bd_ref,   # (2H, 8H)   block-diagonal recurrent weights
                  fcw_f_ref,    # (H, O)
                  fcw_b_ref,    # (H, O)
                  fcb_ref,      # (1, O)
                  out_ref,      # (T*B, O)
                  *, T, B, H):
    # ---- Hoisted input projection: one MXU matmul, biases folded in. -------
    # Row block s already pairs x_s (routed to fwd gate columns) with
    # x_{T-1-s} (routed to bwd gate columns). Result stays in vregs.
    xp = (jnp.dot(x_pair_ref[...], w_pair_ref[...],
                  preferred_element_type=jnp.float32)
          + b_all_ref[...])                               # (T*B, 8H)

    whh_bd = whh_bd_ref[...]                              # (2H, 8H), in vregs

    hcat = jnp.zeros((B, 2 * H), jnp.float32)             # [h_fwd | h_bwd]
    ccat = jnp.zeros((B, 2 * H), jnp.float32)             # [c_fwd | c_bwd]
    hist = []

    # ---- Fully unrolled fused fwd/bwd recurrence. ---------------------------
    # Per step on the serial chain: 1 MXU push (block-diagonal weights), one
    # tanh over all gate columns (sigmoid == 0.5 + 0.5*tanh; the 0.5 pre-scale
    # lives in the weights), one tanh of the cell state, a few VPU fmas.
    for s in range(T):
        g = xp[s * B:(s + 1) * B, :] + jnp.dot(
            hcat, whh_bd, preferred_element_type=jnp.float32)   # (B, 8H)
        t = jnp.tanh(g)
        sg = 0.5 + 0.5 * t[:, :6 * H]        # sigmoid gates [i_f,i_b,f_f,f_b,o_f,o_b]
        i_g = sg[:, 0 * H:2 * H]
        f_g = sg[:, 2 * H:4 * H]
        o_g = sg[:, 4 * H:6 * H]
        c_in = t[:, 6 * H:8 * H]             # cell inputs  [g_f, g_b]
        ccat = f_g * ccat + i_g * c_in
        hcat = o_g * jnp.tanh(ccat)
        hist.append(hcat)

    # ---- FC tail: pair fwd time-t with bwd time-t, two dense 2-D matmuls. ---
    # hist[s] = [h_fwd at time s | h_bwd at time T-1-s].
    hf_all = jnp.concatenate([h[:, :H] for h in hist], axis=0)         # (T*B, H)
    hb_all = jnp.concatenate([h[:, H:] for h in hist[::-1]], axis=0)   # (T*B, H)
    out_ref[...] = (
        jnp.dot(hf_all, fcw_f_ref[...], preferred_element_type=jnp.float32)
        + jnp.dot(hb_all, fcw_b_ref[...], preferred_element_type=jnp.float32)
        + fcb_ref[...]).astype(out_ref.dtype)


def _combine_gates(wf, wb, H, sig_scale=0.5):
    """PyTorch gate order [i, f, g, o] per direction ->
    kernel layout [i_f, i_b, f_f, f_b, o_f, o_b, g_f, g_b] on the last axis.
    Sigmoid-gate (i, f, o) columns are pre-scaled by 0.5 so that in-kernel
    sigmoid(z) == 0.5 + 0.5 * tanh(scaled pre-activation)."""
    pieces = []
    for gi in (0, 1, 3):                      # i, f, o  (sigmoid gates)
        pieces.append(sig_scale * wf[..., gi * H:(gi + 1) * H])
        pieces.append(sig_scale * wb[..., gi * H:(gi + 1) * H])
    pieces.append(wf[..., 2 * H:3 * H])       # g (cell) gate
    pieces.append(wb[..., 2 * H:3 * H])
    return jnp.concatenate(pieces, axis=-1)


def bidirectional_lstm(x, params):
    """x: (T, B, C) float32 -> (T, B, out_ch) float32."""
    T, B, C = x.shape
    H = params['whh_f'].shape[0]
    O = params['fcw'].shape[1]

    # ---- One-time weight rearrangement (plain XLA, outside the kernel). ----
    zC = jnp.zeros((C, 4 * H), jnp.float32)
    zH = jnp.zeros((H, 4 * H), jnp.float32)
    # Input-projection weight for the paired input [x_s | x_{T-1-s}]:
    # rows [0:C) feed only the fwd gate columns, rows [C:2C) only the bwd ones.
    w_pair = _combine_gates(jnp.concatenate([params['wih_f'], zC], axis=0),
                            jnp.concatenate([zC, params['wih_b']], axis=0), H)
    # Block-diagonal recurrent weight acting on [h_fwd | h_bwd].
    whh_bd = _combine_gates(jnp.concatenate([params['whh_f'], zH], axis=0),
                            jnp.concatenate([zH, params['whh_b']], axis=0), H)
    b_all = _combine_gates(params['b_f'], params['b_b'], H)

    # ---- Activations: 2-D, fwd/bwd time pairing baked in (free XLA ops). ---
    x2d = x.reshape(T * B, C)
    xr2d = x[::-1].reshape(T * B, C)
    x_pair = jnp.concatenate([x2d, xr2d], axis=1)         # (T*B, 2C)

    fcw_f = params['fcw'][:H]
    fcw_b = params['fcw'][H:]

    vmem = pl.BlockSpec(memory_space=pltpu.MemorySpace.VMEM)
    kernel = pl.pallas_call(
        functools.partial(bilstm_kernel, T=T, B=B, H=H),
        out_shape=jax.ShapeDtypeStruct((T * B, O), jnp.float32),
        in_specs=[vmem] * 7,
        out_specs=vmem,
    )
    out2 = kernel(x_pair, w_pair, b_all, whh_bd, fcw_f, fcw_b, params['fcb'])
    return out2.reshape(T, B, O)


def init_params(key, in_ch, hidden_ch, out_ch):
    """PyTorch-style uniform(-k, k) init, k = 1/sqrt(hidden_ch).

    Stored in PyTorch gate order [i, f, g, o]; the wrapper reorders/scales for
    the kernel so the reference below can use the canonical layout.
    """
    ks = jax.random.split(key, 12)
    k = 1.0 / jnp.sqrt(jnp.float32(hidden_ch))
    u = lambda kk, shape: jax.random.uniform(kk, shape, jnp.float32, -k, k)

    wih_f = u(ks[0], (4 * hidden_ch, in_ch)).T          # (C, 4H)
    whh_f = u(ks[1], (4 * hidden_ch, hidden_ch)).T      # (H, 4H)
    b_f = (u(ks[2], (4 * hidden_ch,)) + u(ks[3], (4 * hidden_ch,)))[None, :]
    wih_b = u(ks[4], (4 * hidden_ch, in_ch)).T
    whh_b = u(ks[5], (4 * hidden_ch, hidden_ch)).T
    b_b = (u(ks[6], (4 * hidden_ch,)) + u(ks[7], (4 * hidden_ch,)))[None, :]

    k_fc = 1.0 / jnp.sqrt(jnp.float32(2 * hidden_ch))
    fcw = jax.random.uniform(ks[8], (out_ch, 2 * hidden_ch), jnp.float32,
                             -k_fc, k_fc).T              # (2H, O)
    fcb = jax.random.uniform(ks[9], (out_ch,), jnp.float32,
                             -k_fc, k_fc)[None, :]       # (1, O)

    return dict(wih_f=wih_f, whh_f=whh_f, b_f=b_f,
                wih_b=wih_b, whh_b=whh_b, b_b=b_b,
                fcw=fcw, fcb=fcb)


def reference_bidirectional_lstm(x, p):
    """Pure-JAX reference (PyTorch gate order [i, f, g, o]) for validation."""
    T, B, C = x.shape
    H = p['whh_f'].shape[0]

    def cell(carry, x_t, wih, whh, b):
        h, c = carry
        g = x_t @ wih + h @ whh + b
        i = jax.nn.sigmoid(g[:, 0 * H:1 * H])
        f = jax.nn.sigmoid(g[:, 1 * H:2 * H])
        gg = jnp.tanh(g[:, 2 * H:3 * H])
        o = jax.nn.sigmoid(g[:, 3 * H:4 * H])
        c = f * c + i * gg
        h = o * jnp.tanh(c)
        return (h, c), h

    h0 = jnp.zeros((B, H), jnp.float32)
    c0 = jnp.zeros((B, H), jnp.float32)
    _, hf = jax.lax.scan(
        lambda carry, xt: cell(carry, xt, p['wih_f'], p['whh_f'], p['b_f']),
        (h0, c0), x)
    _, hb = jax.lax.scan(
        lambda carry, xt: cell(carry, xt, p['wih_b'], p['whh_b'], p['b_b']),
        (h0, c0), x[::-1])
    hb = hb[::-1]
    hcat = jnp.concatenate([hf, hb], axis=-1)            # (T, B, 2H)
    return hcat @ p['fcw'] + p['fcb']


if __name__ == "__main__":
    T, B = 8, 2          # seq len (w), batch (bs)
    in_ch, hidden_ch, out_ch = 16, 32, 16

    key = jax.random.PRNGKey(0)
    kx, kp = jax.random.split(key)
    x = jax.random.normal(kx, (T, B, in_ch), jnp.float32)
    params = init_params(kp, in_ch, hidden_ch, out_ch)

    out = bidirectional_lstm(x, params)
    out = jax.block_until_ready(out)

    ref = reference_bidirectional_lstm(x, params)
    assert out.shape == (T, B, out_ch)
    assert jnp.allclose(out, ref, rtol=1e-4, atol=1e-4), "mismatch vs reference"

    print("KERNEL_OK")
</pallas_src>

<mosaic_0001>
module attributes {stable_mosaic.version = 11 : i64} {
  func.func @bilstm_kernel(%arg0: memref<16x32xf32, #tpu.memory_space<vmem>>, %arg1: memref<32x256xf32, #tpu.memory_space<vmem>>, %arg2: memref<1x256xf32, #tpu.memory_space<vmem>>, %arg3: memref<64x256xf32, #tpu.memory_space<vmem>>, %arg4: memref<32x16xf32, #tpu.memory_space<vmem>>, %arg5: memref<32x16xf32, #tpu.memory_space<vmem>>, %arg6: memref<1x16xf32, #tpu.memory_space<vmem>>, %arg7: memref<16x16xf32, #tpu.memory_space<vmem>>) attributes {dimension_semantics = [], scalar_prefetch = 0 : i64, scratch_operands = 0 : i64, tpu.core_type = #tpu.core_type<tc>} {
    %c0 = arith.constant 0 : index
    %c0_0 = arith.constant 0 : index
    %0 = vector.load %arg0[%c0, %c0_0] : memref<16x32xf32, #tpu.memory_space<vmem>>, vector<16x32xf32>
    %c0_1 = arith.constant 0 : index
    %c0_2 = arith.constant 0 : index
    %1 = vector.load %arg1[%c0_1, %c0_2] : memref<32x256xf32, #tpu.memory_space<vmem>>, vector<32x256xf32>
    %cst = arith.constant dense<0.000000e+00> : vector<16x256xf32>
    %2 = tpu.matmul %0, %1, %cst {dimension_numbers = #tpu.dot_dimension_numbers<[1], [0], [0], [1], [0, 0, 1, 1], [], []>} : vector<16x32xf32>, vector<32x256xf32>, vector<16x256xf32> -> vector<16x256xf32>
    %c0_3 = arith.constant 0 : index
    %c0_4 = arith.constant 0 : index
    %3 = vector.load %arg2[%c0_3, %c0_4] : memref<1x256xf32, #tpu.memory_space<vmem>>, vector<1x256xf32>
    %4 = vector.broadcast %3 : vector<1x256xf32> to vector<16x256xf32>
    %5 = arith.addf %2, %4 : vector<16x256xf32>
    %c0_5 = arith.constant 0 : index
    %c0_6 = arith.constant 0 : index
    %6 = vector.load %arg3[%c0_5, %c0_6] : memref<64x256xf32, #tpu.memory_space<vmem>>, vector<64x256xf32>
    %cst_7 = arith.constant 0.000000e+00 : f32
    %7 = vector.broadcast %cst_7 : f32 to vector<2x64xf32>
    %cst_8 = arith.constant 0.000000e+00 : f32
    %8 = vector.broadcast %cst_8 : f32 to vector<2x64xf32>
    %9 = vector.extract_strided_slice %5 {offsets = [0, 0], sizes = [2, 256], strides = [1, 1]} : vector<16x256xf32> to vector<2x256xf32>
    %cst_9 = arith.constant dense<0.000000e+00> : vector<2x256xf32>
    %10 = tpu.matmul %7, %6, %cst_9 {dimension_numbers = #tpu.dot_dimension_numbers<[1], [0], [0], [1], [0, 0, 1, 1], [], []>} : vector<2x64xf32>, vector<64x256xf32>, vector<2x256xf32> -> vector<2x256xf32>
    %11 = arith.addf %9, %10 : vector<2x256xf32>
    %12 = math.tanh %11 : vector<2x256xf32>
    %13 = vector.extract_strided_slice %12 {offsets = [0, 0], sizes = [2, 192], strides = [1, 1]} : vector<2x256xf32> to vector<2x192xf32>
    %cst_10 = arith.constant 5.000000e-01 : f32
    %14 = vector.broadcast %cst_10 : f32 to vector<2x192xf32>
    %15 = arith.mulf %14, %13 : vector<2x192xf32>
    %cst_11 = arith.constant 5.000000e-01 : f32
    %16 = vector.broadcast %cst_11 : f32 to vector<2x192xf32>
    %17 = arith.addf %16, %15 : vector<2x192xf32>
    %18 = vector.extract_strided_slice %17 {offsets = [0, 0], sizes = [2, 64], strides = [1, 1]} : vector<2x192xf32> to vector<2x64xf32>
    %19 = vector.extract_strided_slice %17 {offsets = [0, 64], sizes = [2, 64], strides = [1, 1]} : vector<2x192xf32> to vector<2x64xf32>
    %20 = vector.extract_strided_slice %17 {offsets = [0, 128], sizes = [2, 64], strides = [1, 1]} : vector<2x192xf32> to vector<2x64xf32>
    %21 = vector.extract_strided_slice %12 {offsets = [0, 192], sizes = [2, 64], strides = [1, 1]} : vector<2x256xf32> to vector<2x64xf32>
    %22 = arith.mulf %19, %8 : vector<2x64xf32>
    %23 = arith.mulf %18, %21 : vector<2x64xf32>
    %24 = arith.addf %22, %23 : vector<2x64xf32>
    %25 = math.tanh %24 : vector<2x64xf32>
    %26 = arith.mulf %20, %25 : vector<2x64xf32>
    %27 = vector.extract_strided_slice %5 {offsets = [2, 0], sizes = [2, 256], strides = [1, 1]} : vector<16x256xf32> to vector<2x256xf32>
    %cst_12 = arith.constant dense<0.000000e+00> : vector<2x256xf32>
    %28 = tpu.matmul %26, %6, %cst_12 {dimension_numbers = #tpu.dot_dimension_numbers<[1], [0], [0], [1], [0, 0, 1, 1], [], []>} : vector<2x64xf32>, vector<64x256xf32>, vector<2x256xf32> -> vector<2x256xf32>
    %29 = arith.addf %27, %28 : vector<2x256xf32>
    %30 = math.tanh %29 : vector<2x256xf32>
    %31 = vector.extract_strided_slice %30 {offsets = [0, 0], sizes = [2, 192], strides = [1, 1]} : vector<2x256xf32> to vector<2x192xf32>
    %cst_13 = arith.constant 5.000000e-01 : f32
    %32 = vector.broadcast %cst_13 : f32 to vector<2x192xf32>
    %33 = arith.mulf %32, %31 : vector<2x192xf32>
    %cst_14 = arith.constant 5.000000e-01 : f32
    %34 = vector.broadcast %cst_14 : f32 to vector<2x192xf32>
    %35 = arith.addf %34, %33 : vector<2x192xf32>
    %36 = vector.extract_strided_slice %35 {offsets = [0, 0], sizes = [2, 64], strides = [1, 1]} : vector<2x192xf32> to vector<2x64xf32>
    %37 = vector.extract_strided_slice %35 {offsets = [0, 64], sizes = [2, 64], strides = [1, 1]} : vector<2x192xf32> to vector<2x64xf32>
    %38 = vector.extract_strided_slice %35 {offsets = [0, 128], sizes = [2, 64], strides = [1, 1]} : vector<2x192xf32> to vector<2x64xf32>
    %39 = vector.extract_strided_slice %30 {offsets = [0, 192], sizes = [2, 64], strides = [1, 1]} : vector<2x256xf32> to vector<2x64xf32>
    %40 = arith.mulf %37, %24 : vector<2x64xf32>
    %41 = arith.mulf %36, %39 : vector<2x64xf32>
    %42 = arith.addf %40, %41 : vector<2x64xf32>
    %43 = math.tanh %42 : vector<2x64xf32>
    %44 = arith.mulf %38, %43 : vector<2x64xf32>
    %45 = vector.extract_strided_slice %5 {offsets = [4, 0], sizes = [2, 256], strides = [1, 1]} : vector<16x256xf32> to vector<2x256xf32>
    %cst_15 = arith.constant dense<0.000000e+00> : vector<2x256xf32>
    %46 = tpu.matmul %44, %6, %cst_15 {dimension_numbers = #tpu.dot_dimension_numbers<[1], [0], [0], [1], [0, 0, 1, 1], [], []>} : vector<2x64xf32>, vector<64x256xf32>, vector<2x256xf32> -> vector<2x256xf32>
    %47 = arith.addf %45, %46 : vector<2x256xf32>
    %48 = math.tanh %47 : vector<2x256xf32>
    %49 = vector.extract_strided_slice %48 {offsets = [0, 0], sizes = [2, 192], strides = [1, 1]} : vector<2x256xf32> to vector<2x192xf32>
    %cst_16 = arith.constant 5.000000e-01 : f32
    %50 = vector.broadcast %cst_16 : f32 to vector<2x192xf32>
    %51 = arith.mulf %50, %49 : vector<2x192xf32>
    %cst_17 = arith.constant 5.000000e-01 : f32
    %52 = vector.broadcast %cst_17 : f32 to vector<2x192xf32>
    %53 = arith.addf %52, %51 : vector<2x192xf32>
    %54 = vector.extract_strided_slice %53 {offsets = [0, 0], sizes = [2, 64], strides = [1, 1]} : vector<2x192xf32> to vector<2x64xf32>
    %55 = vector.extract_strided_slice %53 {offsets = [0, 64], sizes = [2, 64], strides = [1, 1]} : vector<2x192xf32> to vector<2x64xf32>
    %56 = vector.extract_strided_slice %53 {offsets = [0, 128], sizes = [2, 64], strides = [1, 1]} : vector<2x192xf32> to vector<2x64xf32>
    %57 = vector.extract_strided_slice %48 {offsets = [0, 192], sizes = [2, 64], strides = [1, 1]} : vector<2x256xf32> to vector<2x64xf32>
    %58 = arith.mulf %55, %42 : vector<2x64xf32>
    %59 = arith.mulf %54, %57 : vector<2x64xf32>
    %60 = arith.addf %58, %59 : vector<2x64xf32>
    %61 = math.tanh %60 : vector<2x64xf32>
    %62 = arith.mulf %56, %61 : vector<2x64xf32>
    %63 = vector.extract_strided_slice %5 {offsets = [6, 0], sizes = [2, 256], strides = [1, 1]} : vector<16x256xf32> to vector<2x256xf32>
    %cst_18 = arith.constant dense<0.000000e+00> : vector<2x256xf32>
    %64 = tpu.matmul %62, %6, %cst_18 {dimension_numbers = #tpu.dot_dimension_numbers<[1], [0], [0], [1], [0, 0, 1, 1], [], []>} : vector<2x64xf32>, vector<64x256xf32>, vector<2x256xf32> -> vector<2x256xf32>
    %65 = arith.addf %63, %64 : vector<2x256xf32>
    %66 = math.tanh %65 : vector<2x256xf32>
    %67 = vector.extract_strided_slice %66 {offsets = [0, 0], sizes = [2, 192], strides = [1, 1]} : vector<2x256xf32> to vector<2x192xf32>
    %cst_19 = arith.constant 5.000000e-01 : f32
    %68 = vector.broadcast %cst_19 : f32 to vector<2x192xf32>
    %69 = arith.mulf %68, %67 : vector<2x192xf32>
    %cst_20 = arith.constant 5.000000e-01 : f32
    %70 = vector.broadcast %cst_20 : f32 to vector<2x192xf32>
    %71 = arith.addf %70, %69 : vector<2x192xf32>
    %72 = vector.extract_strided_slice %71 {offsets = [0, 0], sizes = [2, 64], strides = [1, 1]} : vector<2x192xf32> to vector<2x64xf32>
    %73 = vector.extract_strided_slice %71 {offsets = [0, 64], sizes = [2, 64], strides = [1, 1]} : vector<2x192xf32> to vector<2x64xf32>
    %74 = vector.extract_strided_slice %71 {offsets = [0, 128], sizes = [2, 64], strides = [1, 1]} : vector<2x192xf32> to vector<2x64xf32>
    %75 = vector.extract_strided_slice %66 {offsets = [0, 192], sizes = [2, 64], strides = [1, 1]} : vector<2x256xf32> to vector<2x64xf32>
    %76 = arith.mulf %73, %60 : vector<2x64xf32>
    %77 = arith.mulf %72, %75 : vector<2x64xf32>
    %78 = arith.addf %76, %77 : vector<2x64xf32>
    %79 = math.tanh %78 : vector<2x64xf32>
    %80 = arith.mulf %74, %79 : vector<2x64xf32>
    %81 = vector.extract_strided_slice %5 {offsets = [8, 0], sizes = [2, 256], strides = [1, 1]} : vector<16x256xf32> to vector<2x256xf32>
    %cst_21 = arith.constant dense<0.000000e+00> : vector<2x256xf32>
    %82 = tpu.matmul %80, %6, %cst_21 {dimension_numbers = #tpu.dot_dimension_numbers<[1], [0], [0], [1], [0, 0, 1, 1], [], []>} : vector<2x64xf32>, vector<64x256xf32>, vector<2x256xf32> -> vector<2x256xf32>
    %83 = arith.addf %81, %82 : vector<2x256xf32>
    %84 = math.tanh %83 : vector<2x256xf32>
    %85 = vector.extract_strided_slice %84 {offsets = [0, 0], sizes = [2, 192], strides = [1, 1]} : vector<2x256xf32> to vector<2x192xf32>
    %cst_22 = arith.constant 5.000000e-01 : f32
    %86 = vector.broadcast %cst_22 : f32 to vector<2x192xf32>
    %87 = arith.mulf %86, %85 : vector<2x192xf32>
    %cst_23 = arith.constant 5.000000e-01 : f32
    %88 = vector.broadcast %cst_23 : f32 to vector<2x192xf32>
    %89 = arith.addf %88, %87 : vector<2x192xf32>
    %90 = vector.extract_strided_slice %89 {offsets = [0, 0], sizes = [2, 64], strides = [1, 1]} : vector<2x192xf32> to vector<2x64xf32>
    %91 = vector.extract_strided_slice %89 {offsets = [0, 64], sizes = [2, 64], strides = [1, 1]} : vector<2x192xf32> to vector<2x64xf32>
    %92 = vector.extract_strided_slice %89 {offsets = [0, 128], sizes = [2, 64], strides = [1, 1]} : vector<2x192xf32> to vector<2x64xf32>
    %93 = vector.extract_strided_slice %84 {offsets = [0, 192], sizes = [2, 64], strides = [1, 1]} : vector<2x256xf32> to vector<2x64xf32>
    %94 = arith.mulf %91, %78 : vector<2x64xf32>
    %95 = arith.mulf %90, %93 : vector<2x64xf32>
    %96 = arith.addf %94, %95 : vector<2x64xf32>
    %97 = math.tanh %96 : vector<2x64xf32>
    %98 = arith.mulf %92, %97 : vector<2x64xf32>
    %99 = vector.extract_strided_slice %5 {offsets = [10, 0], sizes = [2, 256], strides = [1, 1]} : vector<16x256xf32> to vector<2x256xf32>
    %cst_24 = arith.constant dense<0.000000e+00> : vector<2x256xf32>
    %100 = tpu.matmul %98, %6, %cst_24 {dimension_numbers = #tpu.dot_dimension_numbers<[1], [0], [0], [1], [0, 0, 1, 1], [], []>} : vector<2x64xf32>, vector<64x256xf32>, vector<2x256xf32> -> vector<2x256xf32>
    %101 = arith.addf %99, %100 : vector<2x256xf32>
    %102 = math.tanh %101 : vector<2x256xf32>
    %103 = vector.extract_strided_slice %102 {offsets = [0, 0], sizes = [2, 192], strides = [1, 1]} : vector<2x256xf32> to vector<2x192xf32>
    %cst_25 = arith.constant 5.000000e-01 : f32
    %104 = vector.broadcast %cst_25 : f32 to vector<2x192xf32>
    %105 = arith.mulf %104, %103 : vector<2x192xf32>
    %cst_26 = arith.constant 5.000000e-01 : f32
    %106 = vector.broadcast %cst_26 : f32 to vector<2x192xf32>
    %107 = arith.addf %106, %105 : vector<2x192xf32>
    %108 = vector.extract_strided_slice %107 {offsets = [0, 0], sizes = [2, 64], strides = [1, 1]} : vector<2x192xf32> to vector<2x64xf32>
    %109 = vector.extract_strided_slice %107 {offsets = [0, 64], sizes = [2, 64], strides = [1, 1]} : vector<2x192xf32> to vector<2x64xf32>
    %110 = vector.extract_strided_slice %107 {offsets = [0, 128], sizes = [2, 64], strides = [1, 1]} : vector<2x192xf32> to vector<2x64xf32>
    %111 = vector.extract_strided_slice %102 {offsets = [0, 192], sizes = [2, 64], strides = [1, 1]} : vector<2x256xf32> to vector<2x64xf32>
    %112 = arith.mulf %109, %96 : vector<2x64xf32>
    %113 = arith.mulf %108, %111 : vector<2x64xf32>
    %114 = arith.addf %112, %113 : vector<2x64xf32>
    %115 = math.tanh %114 : vector<2x64xf32>
    %116 = arith.mulf %110, %115 : vector<2x64xf32>
    %117 = vector.extract_strided_slice %5 {offsets = [12, 0], sizes = [2, 256], strides = [1, 1]} : vector<16x256xf32> to vector<2x256xf32>
    %cst_27 = arith.constant dense<0.000000e+00> : vector<2x256xf32>
    %118 = tpu.matmul %116, %6, %cst_27 {dimension_numbers = #tpu.dot_dimension_numbers<[1], [0], [0], [1], [0, 0, 1, 1], [], []>} : vector<2x64xf32>, vector<64x256xf32>, vector<2x256xf32> -> vector<2x256xf32>
    %119 = arith.addf %117, %118 : vector<2x256xf32>
    %120 = math.tanh %119 : vector<2x256xf32>
    %121 = vector.extract_strided_slice %120 {offsets = [0, 0], sizes = [2, 192], strides = [1, 1]} : vector<2x256xf32> to vector<2x192xf32>
    %cst_28 = arith.constant 5.000000e-01 : f32
    %122 = vector.broadcast %cst_28 : f32 to vector<2x192xf32>
    %123 = arith.mulf %122, %121 : vector<2x192xf32>
    %cst_29 = arith.constant 5.000000e-01 : f32
    %124 = vector.broadcast %cst_29 : f32 to vector<2x192xf32>
    %125 = arith.addf %124, %123 : vector<2x192xf32>
    %126 = vector.extract_strided_slice %125 {offsets = [0, 0], sizes = [2, 64], strides = [1, 1]} : vector<2x192xf32> to vector<2x64xf32>
    %127 = vector.extract_strided_slice %125 {offsets = [0, 64], sizes = [2, 64], strides = [1, 1]} : vector<2x192xf32> to vector<2x64xf32>
    %128 = vector.extract_strided_slice %125 {offsets = [0, 128], sizes = [2, 64], strides = [1, 1]} : vector<2x192xf32> to vector<2x64xf32>
    %129 = vector.extract_strided_slice %120 {offsets = [0, 192], sizes = [2, 64], strides = [1, 1]} : vector<2x256xf32> to vector<2x64xf32>
    %130 = arith.mulf %127, %114 : vector<2x64xf32>
    %131 = arith.mulf %126, %129 : vector<2x64xf32>
    %132 = arith.addf %130, %131 : vector<2x64xf32>
    %133 = math.tanh %132 : vector<2x64xf32>
    %134 = arith.mulf %128, %133 : vector<2x64xf32>
    %135 = vector.extract_strided_slice %5 {offsets = [14, 0], sizes = [2, 256], strides = [1, 1]} : vector<16x256xf32> to vector<2x256xf32>
    %cst_30 = arith.constant dense<0.000000e+00> : vector<2x256xf32>
    %136 = tpu.matmul %134, %6, %cst_30 {dimension_numbers = #tpu.dot_dimension_numbers<[1], [0], [0], [1], [0, 0, 1, 1], [], []>} : vector<2x64xf32>, vector<64x256xf32>, vector<2x256xf32> -> vector<2x256xf32>
    %137 = arith.addf %135, %136 : vector<2x256xf32>
    %138 = math.tanh %137 : vector<2x256xf32>
    %139 = vector.extract_strided_slice %138 {offsets = [0, 0], sizes = [2, 192], strides = [1, 1]} : vector<2x256xf32> to vector<2x192xf32>
    %cst_31 = arith.constant 5.000000e-01 : f32
    %140 = vector.broadcast %cst_31 : f32 to vector<2x192xf32>
    %141 = arith.mulf %140, %139 : vector<2x192xf32>
    %cst_32 = arith.constant 5.000000e-01 : f32
    %142 = vector.broadcast %cst_32 : f32 to vector<2x192xf32>
    %143 = arith.addf %142, %141 : vector<2x192xf32>
    %144 = vector.extract_strided_slice %143 {offsets = [0, 0], sizes = [2, 64], strides = [1, 1]} : vector<2x192xf32> to vector<2x64xf32>
    %145 = vector.extract_strided_slice %143 {offsets = [0, 64], sizes = [2, 64], strides = [1, 1]} : vector<2x192xf32> to vector<2x64xf32>
    %146 = vector.extract_strided_slice %143 {offsets = [0, 128], sizes = [2, 64], strides = [1, 1]} : vector<2x192xf32> to vector<2x64xf32>
    %147 = vector.extract_strided_slice %138 {offsets = [0, 192], sizes = [2, 64], strides = [1, 1]} : vector<2x256xf32> to vector<2x64xf32>
    %148 = arith.mulf %145, %132 : vector<2x64xf32>
    %149 = arith.mulf %144, %147 : vector<2x64xf32>
    %150 = arith.addf %148, %149 : vector<2x64xf32>
    %151 = math.tanh %150 : vector<2x64xf32>
    %152 = arith.mulf %146, %151 : vector<2x64xf32>
    %153 = vector.extract_strided_slice %26 {offsets = [0, 0], sizes = [2, 32], strides = [1, 1]} : vector<2x64xf32> to vector<2x32xf32>
    %154 = vector.extract_strided_slice %44 {offsets = [0, 0], sizes = [2, 32], strides = [1, 1]} : vector<2x64xf32> to vector<2x32xf32>
    %155 = vector.extract_strided_slice %62 {offsets = [0, 0], sizes = [2, 32], strides = [1, 1]} : vector<2x64xf32> to vector<2x32xf32>
    %156 = vector.extract_strided_slice %80 {offsets = [0, 0], sizes = [2, 32], strides = [1, 1]} : vector<2x64xf32> to vector<2x32xf32>
    %157 = vector.extract_strided_slice %98 {offsets = [0, 0], sizes = [2, 32], strides = [1, 1]} : vector<2x64xf32> to vector<2x32xf32>
    %158 = vector.extract_strided_slice %116 {offsets = [0, 0], sizes = [2, 32], strides = [1, 1]} : vector<2x64xf32> to vector<2x32xf32>
    %159 = vector.extract_strided_slice %134 {offsets = [0, 0], sizes = [2, 32], strides = [1, 1]} : vector<2x64xf32> to vector<2x32xf32>
    %160 = vector.extract_strided_slice %152 {offsets = [0, 0], sizes = [2, 32], strides = [1, 1]} : vector<2x64xf32> to vector<2x32xf32>
    %161 = tpu.concatenate %153, %154, %155, %156, %157, %158, %159, %160 in 0 : vector<2x32xf32>, vector<2x32xf32>, vector<2x32xf32>, vector<2x32xf32>, vector<2x32xf32>, vector<2x32xf32>, vector<2x32xf32>, vector<2x32xf32> -> vector<16x32xf32>
    %162 = vector.extract_strided_slice %152 {offsets = [0, 32], sizes = [2, 32], strides = [1, 1]} : vector<2x64xf32> to vector<2x32xf32>
    %163 = vector.extract_strided_slice %134 {offsets = [0, 32], sizes = [2, 32], strides = [1, 1]} : vector<2x64xf32> to vector<2x32xf32>
    %164 = vector.extract_strided_slice %116 {offsets = [0, 32], sizes = [2, 32], strides = [1, 1]} : vector<2x64xf32> to vector<2x32xf32>
    %165 = vector.extract_strided_slice %98 {offsets = [0, 32], sizes = [2, 32], strides = [1, 1]} : vector<2x64xf32> to vector<2x32xf32>
    %166 = vector.extract_strided_slice %80 {offsets = [0, 32], sizes = [2, 32], strides = [1, 1]} : vector<2x64xf32> to vector<2x32xf32>
    %167 = vector.extract_strided_slice %62 {offsets = [0, 32], sizes = [2, 32], strides = [1, 1]} : vector<2x64xf32> to vector<2x32xf32>
    %168 = vector.extract_strided_slice %44 {offsets = [0, 32], sizes = [2, 32], strides = [1, 1]} : vector<2x64xf32> to vector<2x32xf32>
    %169 = vector.extract_strided_slice %26 {offsets = [0, 32], sizes = [2, 32], strides = [1, 1]} : vector<2x64xf32> to vector<2x32xf32>
    %170 = tpu.concatenate %162, %163, %164, %165, %166, %167, %168, %169 in 0 : vector<2x32xf32>, vector<2x32xf32>, vector<2x32xf32>, vector<2x32xf32>, vector<2x32xf32>, vector<2x32xf32>, vector<2x32xf32>, vector<2x32xf32> -> vector<16x32xf32>
    %c0_33 = arith.constant 0 : index
    %c0_34 = arith.constant 0 : index
    %171 = vector.load %arg4[%c0_33, %c0_34] : memref<32x16xf32, #tpu.memory_space<vmem>>, vector<32x16xf32>
    %cst_35 = arith.constant dense<0.000000e+00> : vector<16x16xf32>
    %172 = tpu.matmul %161, %171, %cst_35 {dimension_numbers = #tpu.dot_dimension_numbers<[1], [0], [0], [1], [0, 0, 1, 1], [], []>} : vector<16x32xf32>, vector<32x16xf32>, vector<16x16xf32> -> vector<16x16xf32>
    %c0_36 = arith.constant 0 : index
    %c0_37 = arith.constant 0 : index
    %173 = vector.load %arg5[%c0_36, %c0_37] : memref<32x16xf32, #tpu.memory_space<vmem>>, vector<32x16xf32>
    %cst_38 = arith.constant dense<0.000000e+00> : vector<16x16xf32>
    %174 = tpu.matmul %170, %173, %cst_38 {dimension_numbers = #tpu.dot_dimension_numbers<[1], [0], [0], [1], [0, 0, 1, 1], [], []>} : vector<16x32xf32>, vector<32x16xf32>, vector<16x16xf32> -> vector<16x16xf32>
    %175 = arith.addf %172, %174 : vector<16x16xf32>
    %c0_39 = arith.constant 0 : index
    %c0_40 = arith.constant 0 : index
    %176 = vector.load %arg6[%c0_39, %c0_40] : memref<1x16xf32, #tpu.memory_space<vmem>>, vector<1x16xf32>
    %177 = vector.broadcast %176 : vector<1x16xf32> to vector<16x16xf32>
    %178 = arith.addf %175, %177 : vector<16x16xf32>
    %c0_41 = arith.constant 0 : index
    %c0_42 = arith.constant 0 : index
    %179 = vector.load %arg7[%c0_41, %c0_42] : memref<16x16xf32, #tpu.memory_space<vmem>>, vector<16x16xf32>
    tpu.vector_store %arg7[%c0_41, %c0_42], %178 {strides = array<i32>} : memref<16x16xf32, #tpu.memory_space<vmem>>, vector<16x16xf32>,
    return
  }
}

</mosaic_0001>

<bundles_post_ra>
// kernel: tpu_custom_call.1
= control target key start
LH: loop header
LB: loop body
LE: loop exit
PB: predicated region body
PF: predicated region fallthrough
CT: control target
= control target key end

     0   :  { %12 = vsyncpa [#allocation3], 0  ;;  %s1896_s0 = inlined_call_operand.vmem [shape: f32[16,32], index: 0, kind: input, shape index: {}]   ;;  %s1897_s1 = inlined_call_operand.vmem [shape: f32[32,256], index: 1, kind: input, shape index: {}]   ;;  %s1898_s2 = inlined_call_operand.vmem [shape: f32[1,256], index: 2, kind: input, shape index: {}]   ;;  %s1899_s3 = inlined_call_operand.hbm [shape: f32[64,256], index: 3, kind: input, shape index: {}]   ;;  %s1900_s4 = inlined_call_operand.vmem [shape: f32[32,16], index: 4, kind: input, shape index: {}]   ;;  %s1901_s5 = inlined_call_operand.vmem [shape: f32[32,16], index: 5, kind: input, shape index: {}]   ;;  %s1902_s6 = inlined_call_operand.vmem [shape: f32[1,16], index: 6, kind: input, shape index: {}]   ;;  %s1903_s7 = inlined_call_operand.hbm [shape: f32[16,16], index: 7, kind: output, shape index: {}]  }
   0x1   :  { %13 = vsyncpa [#allocation4], 0  ;;  %s1559_s24 = smov [#allocation2]   ;;  %s1511_s28 = scalar_lea.hbm %s1899_s3, 2048 }
   0x2   :  { %s25_s25 = sshll.u32 %s1559_s24, 4  ;;  %p1512_p0 = scmp.ne.s32.totalorder %s1899_s3, %s1511_s28  ;;  %s26_s25 = int_to_ptr.vmem [resolvable:$true] %s25_s25 }
   0x3   :  { %p1515_p1 = scmp.lt.u32.totalorder %s1511_s28, %s1899_s3 }
   0x5   :  { %p1517_p2 = pnand %p1515_p1, %p1512_p0 }
   0x7   :  { %1520 = shalt.err (!%p1517_p2)
}
   0x8   :  { %s1521_s10 = scalar_lea.vmem %s26_s25, 2048  ;;  %p1526_p4 = scmp.lt.s32.totalorder %s26_s25, %s26_s25 }
   0x9   :  { %p1522_p3 = scmp.ne.s32.totalorder %s26_s25, %s1521_s10  ;;  %p1527_p5 = scmp.lt.s32.totalorder %s1521_s10, %s1521_s10 }
   0xb   :  { %p1528_p6 = por %p1527_p5, %p1526_p4 }
   0xd   :  { %p1529_p7 = pnand %p1528_p6, %p1522_p3 }
   0xf   :  { %1532 = shalt.err (!%p1529_p7)
}
  0x10   :  { %s1560_s11 = smov 256   ;;  %s1561_s12 = smov 16  }
  0x11   :  { %31 = dma.hbm_to_vmem [thread:$0]  %s1899_s3, 2048, %s26_s25, [#allocation3], %s1560_s11, %s1560_s11, %s1561_s12  }
  0x12   :  { %1555 = dma.done.wait [#allocation3], 2048  }
  0x13   :  { %1556 = vsyncadd [#allocation3], 4294965248  ;;  %v1562_v0 = vmov 0.0   ;;  %v148_v1 = vld [vmem:[#allocation2 + $0x8] sm:$0xff]  ;;  %v150_v2 = vld [vmem:[#allocation2 + $0x18] sm:$0xff]  ;;  %vm63_vm0 = vcmask 261120   ;;  %v53_v38 = vlaneseq }
  0x14   :  { %134 = vmatprep.mubr.f32.mxu0 %v1562_v0  ;;  %231 = vmatprep.mubr.f32.mxu1 %v1562_v0  ;;  %v147_v3 = vld [vmem:[#allocation2] sm:$0xff]  ;;  %v1622_v4 = vpack.c.bf16 %v150_v2, %v148_v1  ;;  %v149_v5 = vld [vmem:[#allocation2 + $0x10] sm:$0xff]  ;;  %v152_v6 = vld [vmem:[#allocation2 + $0x28] sm:$0xff]  ;;  %s1563_s10 = smov 64   ;;  %vm163_vm1 = vcmask 523264   ;;  %vm1018_vm2 = vcmask 1041408  }
  0x15   :  { %v154_v7 = vld [vmem:[#allocation2 + $0x38] sm:$0xff]  ;;  %v1624_v8 = vpack.c.bf16 %v149_v5, %v147_v3  ;;  %v44_v10 = vld [vmem:[%s1897_s1 + $0x8] sm:$0xff]  ;;  %v151_v12 = vld [vmem:[#allocation2 + $0x20] sm:$0xff]  ;;  %v54_v39 = vshrl.u32 %v53_v38, 7  ;;  %vm1020_vm3 = vcmask 1043456   ;;  %vm1022_vm4 = vcmask 1045504  }
  0x16   :  { %v1626_v9 = vpack.c.bf16 %v154_v7, %v152_v6  ;;  %v46_v11 = vld [vmem:[%s1897_s1 + $0x18] sm:$0xff]  ;;  %1309 = vmatprep.subr.bf16.mxu1 %v1622_v4  ;;  %v153_v14 = vld [vmem:[#allocation2 + $0x30] sm:$0xff]  ;;  %v43_v15 = vld [vmem:[%s1897_s1] sm:$0xff]  ;;  %s1564_s18 = smov 96   ;;  %vm1232_vm5 = vcmask 130048  }
  0x17   :  { %v1300_v13 = vpack.c.bf16 %v46_v11, %v44_v10  ;;  %v45_v16 = vld [vmem:[%s1897_s1 + $0x10] sm:$0xff]  ;;  %1311 = vmatpush1.bf16.msra.mxu1 %v1624_v8  ;;  %v1642_v17 = vpack.c.bf16 %v153_v14, %v151_v12  ;;  %v156_v19 = vld [vmem:[#allocation2 + $0x48] sm:$0xff]  ;;  %v158_v20 = vld [vmem:[#allocation2 + $0x58] sm:$0xff]  ;;  %v59_v40 = vsub.s32 1, %v54_v39  ;;  %v55_v50 = vsub.s32 0, %v54_v39 }
  0x18   :  { %v1302_v18 = vpack.c.bf16 %v45_v16, %v43_v15  ;;  %v48_v21 = vld [vmem:[%s1897_s1 + $0x28] sm:$0xff]  ;;  %1313 = vmatprep.subr.bf16.mxu1 %v1626_v9  ;;  %v1648_v22 = vpack.c.bf16 %v158_v20, %v156_v19  ;;  %v50_v23 = vld [vmem:[%s1897_s1 + $0x38] sm:$0xff]  ;;  %v155_v24 = vld [vmem:[#allocation2 + $0x40] sm:$0xff] }
  0x19   :  { %1301 = vmatprep.subr.bf16.mxu0 %v1300_v13  ;;  %v157_v25 = vld [vmem:[#allocation2 + $0x50] sm:$0xff]  ;;  %v1304_v26 = vpack.c.bf16 %v50_v23, %v48_v21  ;;  %v47_v27 = vld [vmem:[%s1897_s1 + $0x20] sm:$0xff]  ;;  %v160_v29 = vld [vmem:[#allocation2 + $0x68] sm:$0xff] }
  0x1a   :  { %1303 = vmatpush1.bf16.msra.mxu0 %v1302_v18  ;;  %v49_v28 = vld [vmem:[%s1897_s1 + $0x30] sm:$0xff]  ;;  %v162_v31 = vld [vmem:[#allocation2 + $0x78] sm:$0xff]  ;;  %v1660_v32 = vpack.c.bf16 %v157_v25, %v155_v24  ;;  %v159_v34 = vld [vmem:[#allocation2 + $0x60] sm:$0xff] }
  0x1b   :  { %v1306_v30 = vpack.c.bf16 %v49_v28, %v47_v27  ;;  %1315 = vmatpush1.bf16.msra.mxu1 %v1642_v17  ;;  %1305 = vmatprep.subr.bf16.mxu0 %v1304_v26  ;;  %v1663_v33 = vpack.c.bf16 %v162_v31, %v160_v29  ;;  %v161_v35 = vld [vmem:[#allocation2 + $0x70] sm:$0xff]  ;;  %v41_v36 = vld [vmem:[%s1896_s0] sm:$0xff]  ;;  %v42_v59 = vld [vmem:[%s1896_s0 + $0x8] sm:$0xff] }
  0x1c   :  { %1317 = vmatprep.subr.bf16.mxu1 %v1648_v22  ;;  %v1670_v37 = vpack.c.bf16 %v161_v35, %v159_v34  ;;  %v51_v41 = vld [vmem:[%s1898_s2] sm:$0x3] }
  0x1d   :  { %v1698_v43 = vrot.slane %v51_v41, %v59_v40  ;;  %v1705_v51 = vrot.slane %v51_v41, %v55_v50 }
  0x1e   :  { %1307 = vmatpush1.bf16.msra.mxu0 %v1306_v30 }
  0x1f   :  { %1325 = vmatprep.subr.bf16.mxu0 %v1622_v4  ;;  %1319 = vmatpush1.bf16.msra.mxu1 %v1660_v32 }
  0x20   :  { %1321 = vmatprep.subr.bf16.mxu1 %v1663_v33 }
  0x21   :  { %1252 = vmatmul.mubr.msk.f32.vlgmr.msra.gmra.mrb[0].mxu0 %vm63_vm0, %v41_v36 }
  0x22   :  { %1327 = vmatpush1.bf16.msra.mxu0 %v1624_v8  ;;  %140 = vmatprep.mubr.f32.mxu0 %v1562_v0 }
  0x23   :  { %1329 = vmatprep.subr.bf16.mxu0 %v1626_v9  ;;  %1323 = vmatpush1.bf16.msra.mxu1 %v1670_v37 }
  0x24   :  { %1341 = vmatprep.subr.bf16.mxu1 %v1622_v4 }
  0x25   :  { %1253 = vmatmul.mubr.msk.f32.gmra.mrb[2].mxu0 %vm63_vm0, %v42_v59 }
  0x26   :  { %1331 = vmatpush1.bf16.msra.mxu0 %v1642_v17  ;;  %232 = vmatmul.mubr.f32.vlgmr.msra.gmra.mrb[0].mxu1 %v1562_v0 }
  0x27   :  { %1333 = vmatprep.subr.bf16.mxu0 %v1648_v22  ;;  %1343 = vmatpush1.bf16.msra.mxu1 %v1624_v8 }
  0x28   :  { %439 = vmatprep.mubr.f32.mxu1 %v1562_v0  ;;  %1345 = vmatprep.subr.bf16.mxu1 %v1626_v9 }
  0x29   :  { %330 = vmatprep.mubr.f32.mxu0 %v1562_v0 }
  0x2a   :  { %1335 = vmatpush1.bf16.msra.mxu0 %v1660_v32 }
  0x2b   :  { %1337 = vmatprep.subr.bf16.mxu0 %v1663_v33  ;;  %1347 = vmatpush1.bf16.msra.mxu1 %v1642_v17 }
  0x2c   :  { %1349 = vmatprep.subr.bf16.mxu1 %v1648_v22 }
  0x2e   :  { %1339 = vmatpush1.bf16.msra.mxu0 %v1670_v37 }
  0x2f   :  { %1357 = vmatprep.subr.bf16.mxu0 %v1622_v4  ;;  %1351 = vmatpush1.bf16.msra.mxu1 %v1660_v32 }
  0x30   :  { %1353 = vmatprep.subr.bf16.mxu1 %v1663_v33 }
  0x33   :  { %1355 = vmatpush1.bf16.msra.mxu1 %v1670_v37 }
  0x34   :  { %1373 = vmatprep.subr.bf16.mxu1 %v1622_v4 }
  0xf4   :  { %v136_v42 = vpop.f32.mrb[0].mxu0 }
  0xf5   :  { %v138_v44 = vpop.f32.mrb[1].mxu0  ;;  %v1708_v52 = vadd.f32 %v136_v42, %v1705_v51 }
  0xf6   :  { %v1701_v45 = vadd.f32 %v138_v44, %v1698_v43 }
  0xf8   :  { %v1718_v1 = vpop.f32.mrb[2].mxu0 }
  0xf9   :  { %v233_v46 = vpop.f32.mrb[0].mxu1  ;;  %v1720_v2 = vpop.f32.mrb[3].mxu0 }
  0xfa   :  { %v235_v47 = vpop.f32.mrb[1].mxu1  ;;  %v238_v53 = vadd.f32 %v233_v46, %v1708_v52 }
  0xfb   :  { %v239_v48 = vadd.f32 %v235_v47, %v1701_v45 }
  0xfd   :  { %1463 = vtanh.f32 %v239_v48 }
  0xfe   :  { %1465 = vtanh.f32 %v238_v53 }
 0x107   :  { %v1464_v49 = vpop.eup %1463 }
 0x108   :  { %248 = vrot.lane.b32.xlu0 %v1464_v49, %s1563_s10  ;;  %v1466_v54 = vpop.eup %1465  ;;  %v243_v3 = vmul.f32 0.5, %v1464_v49 }
 0x109   :  { %v242_v55 = vmul.f32 0.5, %v1466_v54 }
 0x10a   :  { %v245_v5 = vadd.f32 0.5, %v243_v3 }
 0x10b   :  { %v244_v56 = vadd.f32 0.5, %v242_v55 }
 0x10d   :  { %v246_v60 = vmul.f32 0.0, %v244_v56 }
 0x17a   :  { %v249_v57 = vpop.permute.xlu0 %248 }
 0x17b   :  { %v251_v58 = vmul.f32 %v249_v57, %v244_v56 }
 0x17d   :  { %253 = vrot.lane.b32.xlu0 %v251_v58, %s1563_s10 }
 0x1ef   :  { %v254_v61 = vpop.permute.xlu0 %253 }
 0x1f0   :  { %v256_v62 = vadd.f32 %v254_v61, %v246_v60 }
 0x1f2   :  { %1467 = vtanh.f32 %v256_v62  ;;  %v352_v24 = vrot.slane %v256_v62, 6 }
 0x1fc   :  { %v1468_v63 = vpop.eup %1467 }
 0x1fd   :  { %259 = vrot.lane.b32.xlu1 %v1468_v63, %s1563_s10 }
 0x26f   :  { %v260_v6 = vpop.permute.xlu1 %259 }
 0x270   :  { %v1722_v7 = vmul.f32 %v260_v6, %v245_v5 }
 0x272   :  { %1254 = vmatmul.mubr.msk.f32.vlgmr.msra.gmra.mrb[4].mxu0 %vm163_vm1, %v1722_v7 }
 0x273   :  { %1359 = vmatpush1.bf16.msra.mxu0 %v1624_v8  ;;  %548 = vmatprep.mubr.f32.mxu0 %v1562_v0 }
 0x274   :  { %1361 = vmatprep.subr.bf16.mxu0 %v1626_v9 }
 0x277   :  { %1363 = vmatpush1.bf16.msra.mxu0 %v1642_v17 }
 0x278   :  { %1365 = vmatprep.subr.bf16.mxu0 %v1648_v22 }
 0x27b   :  { %1367 = vmatpush1.bf16.msra.mxu0 %v1660_v32 }
 0x27c   :  { %1369 = vmatprep.subr.bf16.mxu0 %v1663_v33 }
 0x27f   :  { %1371 = vmatpush1.bf16.msra.mxu0 %v1670_v37 }
 0x280   :  { %1389 = vmatprep.subr.bf16.mxu0 %v1622_v4 }
 0x345   :  { %v332_v10 = vpop.f32.mrb[4].mxu0 }
 0x346   :  { %v334_v11 = vpop.f32.mrb[5].mxu0  ;;  %v339_v15 = vrot.slane %v332_v10, 6 }
 0x347   :  { %v340_v12 = vrot.slane %v334_v11, 6 }
 0x348   :  { %v343_v16 = vadd.f32 %v339_v15, %v1708_v52 }
 0x349   :  { %v344_v13 = vadd.f32 %v340_v12, %v1701_v45 }
 0x34b   :  { %1469 = vtanh.f32 %v344_v13 }
 0x34c   :  { %1471 = vtanh.f32 %v343_v16 }
 0x355   :  { %v1470_v14 = vpop.eup %1469 }
 0x356   :  { %356 = vrot.lane.b32.xlu1 %v1470_v14, %s1563_s10  ;;  %v1472_v18 = vpop.eup %1471  ;;  %v348_v29 = vmul.f32 0.5, %v1470_v14 }
 0x357   :  { %v347_v19 = vmul.f32 0.5, %v1472_v18 }
 0x358   :  { %v350_v30 = vadd.f32 0.5, %v348_v29 }
 0x359   :  { %v349_v20 = vadd.f32 0.5, %v347_v19 }
 0x35b   :  { %v354_v25 = vmul.f32 %v352_v24, %v349_v20 }
 0x3c8   :  { %v357_v21 = vpop.permute.xlu1 %356 }
 0x3c9   :  { %v359_v23 = vmul.f32 %v357_v21, %v349_v20 }
 0x3cb   :  { %361 = vrot.lane.b32.xlu0 %v359_v23, %s1563_s10 }
 0x43d   :  { %v362_v26 = vpop.permute.xlu0 %361 }
 0x43e   :  { %v364_v27 = vadd.f32 %v362_v26, %v354_v25 }
 0x440   :  { %1473 = vtanh.f32 %v364_v27  ;;  %v461_v53 = vrot.slane %v364_v27, 6 }
 0x44a   :  { %v1474_v28 = vpop.eup %1473 }
 0x44b   :  { %367 = vrot.lane.b32.xlu1 %v1474_v28, %s1563_s10 }
 0x4bd   :  { %v368_v31 = vpop.permute.xlu1 %367 }
 0x4be   :  { %v1740_v34 = vmul.f32 %v368_v31, %v350_v30 }
 0x4c0   :  { %v372_v35 = vrot.slane %v1740_v34, 2  ;;  %v1019_v62 = vsel %vm1018_vm2, %v1722_v7, %v1740_v34  ;;  %v1039_v31 = vrot.slane %v1740_v34, 6  ;;  %v1796_v34 = vadd.f32 %v1720_v2, %v1698_v43 }
 0x4c2   :  { %1255 = vmatmul.mubr.msk.f32.vlgmr.msra.gmra.mrb[2].mxu1 %vm163_vm1, %v372_v35 }
 0x4c3   :  { %1375 = vmatpush1.bf16.msra.mxu1 %v1624_v8  ;;  %657 = vmatprep.mubr.f32.mxu1 %v1562_v0 }
 0x4c4   :  { %1377 = vmatprep.subr.bf16.mxu1 %v1626_v9 }
 0x4c7   :  { %1379 = vmatpush1.bf16.msra.mxu1 %v1642_v17 }
 0x4c8   :  { %1381 = vmatprep.subr.bf16.mxu1 %v1648_v22 }
 0x4cb   :  { %1383 = vmatpush1.bf16.msra.mxu1 %v1660_v32 }
 0x4cc   :  { %1385 = vmatprep.subr.bf16.mxu1 %v1663_v33 }
 0x4cf   :  { %1387 = vmatpush1.bf16.msra.mxu1 %v1670_v37 }
 0x4d0   :  { %1405 = vmatprep.subr.bf16.mxu1 %v1622_v4 }
 0x595   :  { %v441_v36 = vpop.f32.mrb[2].mxu1 }
 0x596   :  { %v443_v38 = vpop.f32.mrb[3].mxu1  ;;  %v448_v42 = vrot.slane %v441_v36, 4 }
 0x597   :  { %v449_v39 = vrot.slane %v443_v38, 4 }
 0x598   :  { %v452_v44 = vadd.f32 %v448_v42, %v1708_v52  ;;  %v1802_v42 = vadd.f32 %v1718_v1, %v1705_v51 }
 0x599   :  { %v453_v40 = vadd.f32 %v449_v39, %v1701_v45 }
 0x59b   :  { %1475 = vtanh.f32 %v453_v40 }
 0x59c   :  { %1477 = vtanh.f32 %v452_v44 }
 0x5a5   :  { %v1476_v41 = vpop.eup %1475 }
 0x5a6   :  { %465 = vrot.lane.b32.xlu0 %v1476_v41, %s1563_s10  ;;  %v1478_v46 = vpop.eup %1477  ;;  %v457_v58 = vmul.f32 0.5, %v1476_v41 }
 0x5a7   :  { %v456_v47 = vmul.f32 0.5, %v1478_v46 }
 0x5a8   :  { %v459_v59 = vadd.f32 0.5, %v457_v58 }
 0x5a9   :  { %v458_v48 = vadd.f32 0.5, %v456_v47 }
 0x5ab   :  { %v463_v54 = vmul.f32 %v461_v53, %v458_v48 }
 0x618   :  { %v466_v49 = vpop.permute.xlu0 %465 }
 0x619   :  { %v468_v50 = vmul.f32 %v466_v49, %v458_v48 }
 0x61b   :  { %470 = vrot.lane.b32.xlu1 %v468_v50, %s1563_s10 }
 0x68d   :  { %v471_v55 = vpop.permute.xlu1 %470 }
 0x68e   :  { %v473_v56 = vadd.f32 %v471_v55, %v463_v54 }
 0x690   :  { %1479 = vtanh.f32 %v473_v56 }
 0x69a   :  { %v1480_v57 = vpop.eup %1479 }
 0x69b   :  { %476 = vrot.lane.b32.xlu0 %v1480_v57, %s1563_s10 }
 0x70d   :  { %v477_v60 = vpop.permute.xlu0 %476 }
 0x70e   :  { %v479_v61 = vmul.f32 %v477_v60, %v459_v59 }
 0x710   :  { %v481_v63 = vrot.slane %v479_v61, 4  ;;  %v1021_v3 = vsel %vm1020_vm3, %v1019_v62, %v479_v61  ;;  %v1037_v28 = vrot.slane %v479_v61, 2 }
 0x712   :  { %1256 = vmatmul.mubr.msk.f32.vlgmr.msra.gmra.mrb[6].mxu0 %vm163_vm1, %v481_v63 }
 0x713   :  { %1391 = vmatpush1.bf16.msra.mxu0 %v1624_v8  ;;  %759 = vmatprep.mubr.f32.mxu0 %v1562_v0 }
 0x714   :  { %1393 = vmatprep.subr.bf16.mxu0 %v1626_v9 }
 0x717   :  { %1395 = vmatpush1.bf16.msra.mxu0 %v1642_v17 }
 0x718   :  { %1397 = vmatprep.subr.bf16.mxu0 %v1648_v22 }
 0x71b   :  { %1399 = vmatpush1.bf16.msra.mxu0 %v1660_v32 }
 0x71c   :  { %1401 = vmatprep.subr.bf16.mxu0 %v1663_v33 }
 0x71f   :  { %1403 = vmatpush1.bf16.msra.mxu0 %v1670_v37 }
 0x720   :  { %1421 = vmatprep.subr.bf16.mxu0 %v1622_v4  ;;  %v570_v4 = vrot.slane %v473_v56, 6 }
 0x7e5   :  { %v550_v5 = vpop.f32.mrb[6].mxu0 }
 0x7e6   :  { %v552_v6 = vpop.f32.mrb[7].mxu0  ;;  %v557_v13 = vrot.slane %v550_v5, 2 }
 0x7e7   :  { %v558_v10 = vrot.slane %v552_v6, 2 }
 0x7e8   :  { %v561_v14 = vadd.f32 %v557_v13, %v1708_v52 }
 0x7e9   :  { %v562_v11 = vadd.f32 %v558_v10, %v1701_v45 }
 0x7eb   :  { %1481 = vtanh.f32 %v562_v11 }
 0x7ec   :  { %1483 = vtanh.f32 %v561_v14 }
 0x7f5   :  { %v1482_v12 = vpop.eup %1481 }
 0x7f6   :  { %574 = vrot.lane.b32.xlu1 %v1482_v12, %s1563_s10  ;;  %v1484_v15 = vpop.eup %1483  ;;  %v566_v25 = vmul.f32 0.5, %v1482_v12 }
 0x7f7   :  { %v565_v16 = vmul.f32 0.5, %v1484_v15 }
 0x7f8   :  { %v568_v26 = vadd.f32 0.5, %v566_v25 }
 0x7f9   :  { %v567_v18 = vadd.f32 0.5, %v565_v16 }
 0x7fb   :  { %v572_v21 = vmul.f32 %v570_v4, %v567_v18 }
 0x868   :  { %v575_v19 = vpop.permute.xlu1 %574 }
 0x869   :  { %v577_v20 = vmul.f32 %v575_v19, %v567_v18 }
 0x86b   :  { %579 = vrot.lane.b32.xlu0 %v577_v20, %s1563_s10 }
 0x8dd   :  { %v580_v23 = vpop.permute.xlu0 %579 }
 0x8de   :  { %v582_v24 = vadd.f32 %v580_v23, %v572_v21 }
 0x8e0   :  { %1485 = vtanh.f32 %v582_v24  ;;  %v673_v49 = vrot.slane %v582_v24, 6 }
 0x8ea   :  { %v1486_v45 = vpop.eup %1485 }
 0x8eb   :  { %585 = vrot.lane.b32.xlu1 %v1486_v45, %s1563_s10 }
 0x95d   :  { %v586_v27 = vpop.permute.xlu1 %585 }
 0x95e   :  { %v588_v52 = vmul.f32 %v586_v27, %v568_v26 }
 0x960   :  { %v590_v29 = vrot.slane %v588_v52, 6  ;;  %v1778_v30 = vsel %vm1022_vm4, %v1021_v3, %v588_v52 }
 0x962   :  { %1257 = vmatmul.mubr.msk.f32.vlgmr.msra.gmra.mrb[4].mxu1 %vm163_vm1, %v590_v29  ;;  %v1046_v35 = vsel %vm1018_vm2, %v590_v29, %v1037_v28 }
 0x963   :  { %1407 = vmatpush1.bf16.msra.mxu1 %v1624_v8  ;;  %868 = vmatprep.mubr.f32.mxu1 %v1562_v0  ;;  %v1786_v36 = vsel %vm1020_vm3, %v1046_v35, %v1039_v31 }
 0x964   :  { %1409 = vmatprep.subr.bf16.mxu1 %v1626_v9 }
 0x967   :  { %1411 = vmatpush1.bf16.msra.mxu1 %v1642_v17 }
 0x968   :  { %1413 = vmatprep.subr.bf16.mxu1 %v1648_v22 }
 0x96b   :  { %1415 = vmatpush1.bf16.msra.mxu1 %v1660_v32 }
 0x96c   :  { %1417 = vmatprep.subr.bf16.mxu1 %v1663_v33 }
 0x96f   :  { %1419 = vmatpush1.bf16.msra.mxu1 %v1670_v37 }
 0xa35   :  { %v659_v38 = vpop.f32.mrb[4].mxu1 }
 0xa36   :  { %v661_v39 = vpop.f32.mrb[5].mxu1  ;;  %v664_v44 = vadd.f32 %v659_v38, %v1802_v42 }
 0xa37   :  { %v665_v40 = vadd.f32 %v661_v39, %v1796_v34 }
 0xa39   :  { %1487 = vtanh.f32 %v665_v40 }
 0xa3a   :  { %1489 = vtanh.f32 %v664_v44 }
 0xa43   :  { %v1488_v41 = vpop.eup %1487 }
 0xa44   :  { %677 = vrot.lane.b32.xlu0 %v1488_v41, %s1563_s10  ;;  %v1490_v46 = vpop.eup %1489  ;;  %v669_v51 = vmul.f32 0.5, %v1488_v41 }
 0xa45   :  { %v668_v47 = vmul.f32 0.5, %v1490_v46 }
 0xa46   :  { %v671_v1 = vadd.f32 0.5, %v669_v51 }
 0xa47   :  { %v670_v48 = vadd.f32 0.5, %v668_v47 }
 0xa49   :  { %v675_v50 = vmul.f32 %v673_v49, %v670_v48 }
 0xab6   :  { %v678_v43 = vpop.permute.xlu0 %677 }
 0xab7   :  { %v680_v2 = vmul.f32 %v678_v43, %v670_v48 }
 0xab9   :  { %682 = vrot.lane.b32.xlu1 %v680_v2, %s1563_s10 }
 0xb2b   :  { %v683_v53 = vpop.permute.xlu1 %682 }
 0xb2c   :  { %v685_v54 = vadd.f32 %v683_v53, %v675_v50 }
 0xb2e   :  { %1491 = vtanh.f32 %v685_v54 }
 0xb38   :  { %v1492_v55 = vpop.eup %1491 }
 0xb39   :  { %688 = vrot.lane.b32.xlu0 %v1492_v55, %s1563_s10 }
 0xbab   :  { %v689_v56 = vpop.permute.xlu0 %688 }
 0xbac   :  { %v1807_v57 = vmul.f32 %v689_v56, %v671_v1 }
 0xbae   :  { %1258 = vmatmul.mubr.msk.f32.vlgmr.msra.gmra.mrb[8].mxu0 %vm163_vm1, %v1807_v57 }
 0xbaf   :  { %1423 = vmatpush1.bf16.msra.mxu0 %v1624_v8  ;;  %977 = vmatprep.mubr.f32.mxu0 %v1562_v0 }
 0xbb0   :  { %1425 = vmatprep.subr.bf16.mxu0 %v1626_v9 }
 0xbb3   :  { %1427 = vmatpush1.bf16.msra.mxu0 %v1642_v17 }
 0xbb4   :  { %1429 = vmatprep.subr.bf16.mxu0 %v1648_v22 }
 0xbb7   :  { %1431 = vmatpush1.bf16.msra.mxu0 %v1660_v32 }
 0xbb8   :  { %1433 = vmatprep.subr.bf16.mxu0 %v1663_v33 }
 0xbbb   :  { %1435 = vmatpush1.bf16.msra.mxu0 %v1670_v37  ;;  %v781_v37 = vrot.slane %v685_v54, 6 }
 0xc81   :  { %v761_v58 = vpop.f32.mrb[8].mxu0 }
 0xc82   :  { %v763_v59 = vpop.f32.mrb[9].mxu0  ;;  %v768_v0 = vrot.slane %v761_v58, 6 }
 0xc83   :  { %v769_v60 = vrot.slane %v763_v59, 6 }
 0xc84   :  { %v772_v9 = vadd.f32 %v768_v0, %v1802_v42 }
 0xc85   :  { %v773_v61 = vadd.f32 %v769_v60, %v1796_v34 }
 0xc87   :  { %1493 = vtanh.f32 %v773_v61 }
 0xc88   :  { %1495 = vtanh.f32 %v772_v9  ;;  %v1056_v9 = vld [vmem:[%s1901_s5 + $0x18] sm:$0xff] }
 0xc91   :  { %v1494_v8 = vpop.eup %1493 }
 0xc92   :  { %785 = vrot.lane.b32.xlu1 %v1494_v8, %s1563_s10  ;;  %v1496_v17 = vpop.eup %1495  ;;  %v777_v10 = vmul.f32 0.5, %v1494_v8  ;;  %v1055_v8 = vld [vmem:[%s1901_s5 + $0x10] sm:$0xff] }
 0xc93   :  { %v776_v22 = vmul.f32 0.5, %v1496_v17  ;;  %v1440_v17 = vpack.c.bf16 %v1056_v9, %v1055_v8 }
 0xc94   :  { %v779_v11 = vadd.f32 0.5, %v777_v10 }
 0xc95   :  { %v778_v32 = vadd.f32 0.5, %v776_v22 }
 0xc97   :  { %v783_v63 = vmul.f32 %v781_v37, %v778_v32  ;;  %v1050_v37 = vld [vmem:[%s1900_s4 + $0x8] sm:$0xff] }
 0xd04   :  { %v786_v62 = vpop.permute.xlu1 %785 }
 0xd05   :  { %v788_v33 = vmul.f32 %v786_v62, %v778_v32  ;;  %v1041_v32 = vrot.slane %v1722_v7, 2 }
 0xd07   :  { %790 = vrot.lane.b32.xlu0 %v788_v33, %s1563_s10  ;;  %v1048_v62 = vsel %vm1022_vm4, %v1786_v36, %v1041_v32  ;;  %v1049_v33 = vld [vmem:[%s1900_s4] sm:$0xff] }
 0xd79   :  { %v791_v3 = vpop.permute.xlu0 %790 }
 0xd7a   :  { %v793_v5 = vadd.f32 %v791_v3, %v783_v63  ;;  %v1444_v63 = vpack.c.bf16 %v1050_v37, %v1049_v33 }
 0xd7c   :  { %1497 = vtanh.f32 %v793_v5  ;;  %v890_v27 = vrot.slane %v793_v5, 6 }
 0xd86   :  { %v1498_v6 = vpop.eup %1497 }
 0xd87   :  { %796 = vrot.lane.b32.xlu1 %v1498_v6, %s1563_s10 }
 0xdf9   :  { %v797_v12 = vpop.permute.xlu1 %796 }
 0xdfa   :  { %v1824_v13 = vmul.f32 %v797_v12, %v779_v11 }
 0xdfc   :  { %v801_v14 = vrot.slane %v1824_v13, 2  ;;  %v1024_v41 = vsel %vm1018_vm2, %v1807_v57, %v1824_v13  ;;  %v1032_v12 = vrot.slane %v1824_v13, 6 }
 0xdfe   :  { %1259 = vmatmul.mubr.msk.f32.vlgmr.msra.gmra.mrb[6].mxu1 %vm163_vm1, %v801_v14  ;;  %v1034_v14 = vrot.slane %v1807_v57, 2  ;;  %v1265_v57 = vld [vmem:[%s1902_s6] ss:$0 sm:$0xff] }
 0xed1   :  { %v870_v15 = vpop.f32.mrb[6].mxu1 }
 0xed2   :  { %v872_v16 = vpop.f32.mrb[7].mxu1  ;;  %v877_v4 = vrot.slane %v870_v15, 4 }
 0xed3   :  { %v878_v18 = vrot.slane %v872_v16, 4 }
 0xed4   :  { %v881_v21 = vadd.f32 %v877_v4, %v1802_v42 }
 0xed5   :  { %v882_v19 = vadd.f32 %v878_v18, %v1796_v34 }
 0xed7   :  { %1499 = vtanh.f32 %v882_v19  ;;  %v1051_v19 = vld [vmem:[%s1900_s4 + $0x10] sm:$0xff] }
 0xed8   :  { %1501 = vtanh.f32 %v881_v21 }
 0xee1   :  { %v1500_v20 = vpop.eup %1499 }
 0xee2   :  { %894 = vrot.lane.b32.xlu0 %v1500_v20, %s1563_s10  ;;  %v1502_v23 = vpop.eup %1501  ;;  %v886_v35 = vmul.f32 0.5, %v1500_v20  ;;  %v1052_v20 = vld [vmem:[%s1900_s4 + $0x18] sm:$0xff]  ;;  %s1565_s4 = smov [#allocation5]  }
 0xee3   :  { %v885_v24 = vmul.f32 0.5, %v1502_v23  ;;  %v1448_v21 = vpack.c.bf16 %v1052_v20, %v1051_v19  ;;  %s1240_s28 = sshll.u32 %s1565_s4, 4  ;;  %s1241_s28 = int_to_ptr.vmem [resolvable:$true] %s1240_s28 }
 0xee4   :  { %v888_v38 = vadd.f32 0.5, %v886_v35  ;;  %s1533_s29 = scalar_lea.vmem %s1241_s28, 256  ;;  %p1538_p9 = scmp.lt.s32.totalorder %s1241_s28, %s1241_s28 }
 0xee5   :  { %v887_v45 = vadd.f32 0.5, %v885_v24  ;;  %p1534_p8 = scmp.ne.s32.totalorder %s1241_s28, %s1533_s29  ;;  %p1539_p10 = scmp.lt.s32.totalorder %s1533_s29, %s1533_s29 }
 0xee7   :  { %v892_v52 = vmul.f32 %v890_v27, %v887_v45  ;;  %p1540_p11 = por %p1539_p10, %p1538_p9 }
 0xee9   :  { %p1541_p12 = pnand %p1540_p11, %p1534_p8 }
 0xf54   :  { %v895_v25 = vpop.permute.xlu0 %894 }
 0xf55   :  { %v897_v26 = vmul.f32 %v895_v25, %v887_v45 }
 0xf57   :  { %899 = vrot.lane.b32.xlu1 %v897_v26, %s1563_s10 }
 0xfc9   :  { %v900_v28 = vpop.permute.xlu1 %899 }
 0xfca   :  { %v902_v29 = vadd.f32 %v900_v28, %v892_v52 }
 0xfcc   :  { %1503 = vtanh.f32 %v902_v29  ;;  %v999_v58 = vrot.slane %v902_v29, 6 }
 0xfd6   :  { %v1504_v31 = vpop.eup %1503 }
 0xfd7   :  { %905 = vrot.lane.b32.xlu0 %v1504_v31, %s1563_s10 }
0x1049   :  { %v906_v39 = vpop.permute.xlu0 %905 }
0x104a   :  { %v908_v40 = vmul.f32 %v906_v39, %v888_v38 }
0x104c   :  { %v910_v44 = vrot.slane %v908_v40, 4  ;;  %v1025_v46 = vsel %vm1020_vm3, %v1024_v41, %v908_v40  ;;  %v1030_v10 = vrot.slane %v908_v40, 2 }
0x104e   :  { %1260 = vmatmul.mubr.msk.f32.vlgmr.msra.gmra.mrb[10].mxu0 %vm163_vm1, %v910_v44 }
0x1121   :  { %v979_v47 = vpop.f32.mrb[10].mxu0 }
0x1122   :  { %v981_v48 = vpop.f32.mrb[11].mxu0  ;;  %v986_v50 = vrot.slane %v979_v47, 2 }
0x1123   :  { %v987_v43 = vrot.slane %v981_v48, 2 }
0x1124   :  { %v990_v53 = vadd.f32 %v986_v50, %v1802_v42  ;;  %v1054_v42 = vld [vmem:[%s1901_s5 + $0x8] sm:$0xff] }
0x1125   :  { %v991_v2 = vadd.f32 %v987_v43, %v1796_v34  ;;  %v1053_v34 = vld [vmem:[%s1901_s5] sm:$0xff] }
0x1126   :  { %v1436_v0 = vpack.c.bf16 %v1054_v42, %v1053_v34 }
0x1127   :  { %1505 = vtanh.f32 %v991_v2 }
0x1128   :  { %1507 = vtanh.f32 %v990_v53  ;;  %1437 = vmatprep.subr.bf16.mxu1 %v1436_v0 }
0x1129   :  { %1439 = vmatpush3.bf16.msra.mxu1 %v1436_v0 }
0x112a   :  { %1441 = vmatprep.subr.bf16.mxu1 %v1440_v17 }
0x112d   :  { %1443 = vmatpush3.bf16.msra.mxu1 %v1440_v17 }
0x112e   :  { %1445 = vmatprep.subr.bf16.mxu1 %v1444_v63 }
0x1131   :  { %v1506_v49 = vpop.eup %1505 }
0x1132   :  { %1003 = vrot.lane.b32.xlu1 %v1506_v49, %s1563_s10  ;;  %v1508_v54 = vpop.eup %1507  ;;  %v995_v3 = vmul.f32 0.5, %v1506_v49 }
0x1133   :  { %v994_v55 = vmul.f32 0.5, %v1508_v54 }
0x1134   :  { %v997_v5 = vadd.f32 0.5, %v995_v3 }
0x1135   :  { %v996_v51 = vadd.f32 0.5, %v994_v55 }
0x1137   :  { %v1001_v59 = vmul.f32 %v999_v58, %v996_v51 }
0x11a4   :  { %v1004_v1 = vpop.permute.xlu1 %1003 }
0x11a5   :  { %v1006_v56 = vmul.f32 %v1004_v1, %v996_v51 }
0x11a7   :  { %1008 = vrot.lane.b32.xlu0 %v1006_v56, %s1563_s10 }
0x1219   :  { %v1009_v60 = vpop.permute.xlu0 %1008 }
0x121a   :  { %v1011_v61 = vadd.f32 %v1009_v60, %v1001_v59 }
0x121c   :  { %1509 = vtanh.f32 %v1011_v61 }
0x1226   :  { %v1510_v22 = vpop.eup %1509 }
0x1227   :  { %1014 = vrot.lane.b32.xlu1 %v1510_v22, %s1563_s10 }
0x122b   :  { %1061 = vrot.lane.b32.xlu1 %v1048_v62, %s1564_s18 }
0x1299   :  { %v1015_v6 = vpop.permute.xlu1 %1014 }
0x129a   :  { %v1017_v7 = vmul.f32 %v1015_v6, %v997_v5 }
0x129c   :  { %v1026_v11 = vsel %vm1022_vm4, %v1025_v46, %v1017_v7  ;;  %v1028_v36 = vrot.slane %v1017_v7, 6 }
0x129d   :  { %v1062_v13 = vpop.permute.xlu1 %1061 }
0x129e   :  { %v1043_v15 = vsel %vm1018_vm2, %v1028_v36, %v1030_v10 }
0x129f   :  { %v1044_v16 = vsel %vm1020_vm3, %v1043_v15, %v1032_v12 }
0x12a0   :  { %v1045_v18 = vsel %vm1022_vm4, %v1044_v16, %v1034_v14 }
0x12a1   :  { %1059 = vrot.lane.b32.xlu0 %v1045_v18, %s1564_s18 }
0x1313   :  { %v1060_v4 = vpop.permute.xlu0 %1059 }
0x1314   :  { %1286 = vmatprep.mubr.msk.f32.mxu1 %vm63_vm0, %v1060_v4 }
0x1315   :  { %1287 = vmatmul.mubr.msk.f32.vlgmr.msra.gmra.mrb[8].mxu1 %vm63_vm0, %v1062_v13 }
0x1316   :  { %1447 = vmatpush3.bf16.msra.mxu1 %v1444_v63  ;;  %1297 = vmatprep.mubr.msk.f32.mxu1 %vm63_vm0, %v1778_v30 }
0x1317   :  { %1449 = vmatprep.subr.bf16.mxu1 %v1448_v21 }
0x131a   :  { %1451 = vmatpush3.bf16.msra.mxu1 %v1448_v21 }
0x131d   :  { %1298 = vmatmul.mubr.msk.f32.vlgmr.msra.gmra.mrb[8].mxu1 %vm63_vm0, %v1026_v11 }
0x13f0   :  { %v1299_v23 = vpop.f32.mrb[8].mxu1 }
0x13f1   :  { %v1231_v24 = vadd.f32 %v1299_v23, %v1265_v57  ;;  %v1214_v45 = vpop.f32.mrb[9].mxu1 }
0x13f2   :  { %v1230_v25 = vadd.f32 %v1265_v57, %v1214_v45 }
0x13f3   :  { %1234 = vst.msk [vmem:[#allocation5 + $0x8] sm:$0xff] %vm1232_vm5, %v1231_v24 }
0x13f4   :  { %1233 = vst.msk [vmem:[#allocation5] sm:$0xff] %vm1232_vm5, %v1230_v25 }
0x13f5   :  { %1544 = shalt.err (!%p1541_p12)
}
0x13f6   :  { %s1545_s6 = scalar_lea.hbm %s1903_s7, 256 }
0x13f7   :  { %p1546_p13 = scmp.ne.s32.totalorder %s1903_s7, %s1545_s6  ;;  %p1549_p0 = scmp.lt.u32.totalorder %s1545_s6, %s1903_s7 }
0x13f9   :  { %p1551_p1 = pnand %p1549_p0, %p1546_p13 }
0x13fb   :  { %1554 = shalt.err (!%p1551_p1)
}
0x13fc   :  { %s1566_s11 = smov 128   ;;  %s1567_s0 = smov 8  }
0x13fd   :  { %1246 = dma.vmem_to_hbm [thread:$0]  %s1241_s28, 256, %s1903_s7, [#allocation4], %s1566_s11, %s1566_s11, %s1567_s0  }
0x13fe   :  { %1557 = dma.done.wait [#allocation4], 256  }
0x13ff   :  { %1558 = vsyncadd [#allocation4], 4294967040 }
0x1400   :  { %1250 = vsyncpa [#allocation3], 1 }
0x1401   :  { %1251 = vsyncpa [#allocation4], 1 }

</bundles_post_ra>
